<compile_context>
chip_gen: v7x
topology: tpu7x:2x2x1
jax: 0.10.0
libtpu: 0.0.40
codegen_flags: <defaults>
</compile_context>

<pallas_src>
import functools

import jax
import jax.numpy as jnp
from jax.experimental import pallas as pl
from jax.experimental.pallas import tpu as pltpu

BN_EPS = 1e-5
_VMEM_TILE_BUDGET = 24 * 1024 * 1024   # conservative per-step footprint target
_VMEM_LIMIT_BYTES = 32 * 1024 * 1024   # raise v5e's 16 MiB default; fits v6e/v7x


# --------------------------------------------------------------------------- #
# Kernel
# --------------------------------------------------------------------------- #
def mlp_kernel(x_ref, w1_ref, g_ref, beta_ref, w2_ref, b2_ref, o_ref):
    """One (p, k) grid step: Linear1(tile_h) -> BN(train) -> ReLU -> Linear2-acc."""
    p = pl.program_id(0)            # projection tile index ("parallel")
    k = pl.program_id(1)            # hidden / reduction tile index (last axis)
    tile_h = w1_ref.shape[1]
    tile_p = o_ref.shape[1]

    # ---- Linear 1 (bf16 operands, f32 accumulate on the MXU).
    # b1 intentionally omitted: it cancels exactly in (h - mean) under
    # training-mode BatchNorm.
    h = jnp.dot(x_ref[...], w1_ref[...], preferred_element_type=jnp.float32)

    # ---- BatchNorm1d (training mode) statistics in one pass over h (f32).
    inv_b = 1.0 / h.shape[0]
    mean = jnp.sum(h, axis=0, keepdims=True) * inv_b          # (1, tile_h)
    ex2 = jnp.sum(h * h, axis=0, keepdims=True) * inv_b       # (1, tile_h)
    var = jnp.maximum(ex2 - mean * mean, 0.0)

    # gamma / beta are whole-array resident; slice out this hidden tile.
    h_start = k * tile_h
    if tile_h % 128 == 0:
        h_start = pl.multiple_of(h_start, 128)
    g = g_ref[:, pl.ds(h_start, tile_h)]
    b = beta_ref[:, pl.ds(h_start, tile_h)]

    # BN + affine folded into one per-feature FMA; rsqrt -> EUP slot.
    scale = g * jax.lax.rsqrt(var + BN_EPS)                   # (1, tile_h)
    shift = b - mean * scale                                  # (1, tile_h)
    a = jnp.maximum(h * scale + shift, 0.0)                   # (B, tile_h) f32

    # ---- Linear 2: accumulate into the resident f32 output block, seeded
    # with the (resident) output bias on the first reduction step.
    p_start = p * tile_p
    if tile_p % 128 == 0:
        p_start = pl.multiple_of(p_start, 128)

    @pl.when(k == 0)
    def _():
        o_ref[...] = jnp.broadcast_to(b2_ref[:, pl.ds(p_start, tile_p)],
                                      o_ref.shape)

    o_ref[...] += jnp.dot(a.astype(w2_ref.dtype), w2_ref[...],
                          preferred_element_type=jnp.float32)


# --------------------------------------------------------------------------- #
# Tile selection (explicit VMEM footprint model)
# --------------------------------------------------------------------------- #
def _tile_candidates(n):
    """Divisors of n that are multiples of 128 (plus n itself), largest first."""
    cands = {n}
    d = (n // 128) * 128
    while d >= 128:
        if n % d == 0:
            cands.add(d)
        d -= 128
    return sorted(cands, reverse=True)


def _step_vmem_bytes(B, F, H, P, tile_h, tile_p):
    return (B * F * 2                     # x resident (bf16)
            + 2 * F * tile_h * 2          # W1 tile, double-buffered (bf16)
            + 2 * H * 4                   # gamma + beta resident (f32)
            + 2 * tile_h * tile_p * 2     # W2 tile, double-buffered (bf16)
            + P * 4                       # b2 resident (f32)
            + 2 * B * tile_p * 4          # output block (f32)
            + 3 * B * tile_h * 4)         # h / a / stat temporaries (f32)


def _choose_tiles(B, F, H, P, budget=_VMEM_TILE_BUDGET):
    # Prefer tile_p = P (W1 / gamma / beta streamed exactly once, Linear-1
    # computed exactly once), then the fattest hidden tile that fits.
    for tp in _tile_candidates(P):
        for th in _tile_candidates(H):
            if _step_vmem_bytes(B, F, H, P, th, tp) <= budget:
                return th, tp
    raise ValueError(
        f"MLP shapes B={B}, F={F}, H={H}, P={P} do not fit the "
        f"{budget // (1024 * 1024)} MiB per-step VMEM budget; the full batch "
        "must fit on-chip because BatchNorm statistics span the whole batch.")


# --------------------------------------------------------------------------- #
# Wrapper
# --------------------------------------------------------------------------- #
def prepare_mlp_params(w1, b1, gamma, beta, w2, b2):
    """One-time conversion of (in, out)-layout f32 params to kernel dtypes.

    Do this at parameter-construction time so the bf16 weight copies are NOT
    re-created (and re-read from HBM) on every forward call.
    `b1` is accepted for interface parity but unused: it cancels exactly
    under training-mode BatchNorm.
    """
    del b1  # mathematically a no-op under training-mode BatchNorm
    return dict(
        w1=jnp.asarray(w1, jnp.bfloat16),
        gamma=jnp.asarray(gamma, jnp.float32).reshape(1, -1),
        beta=jnp.asarray(beta, jnp.float32).reshape(1, -1),
        w2=jnp.asarray(w2, jnp.bfloat16),
        b2=jnp.asarray(b2, jnp.float32).reshape(1, -1),
    )


@functools.partial(jax.jit, static_argnames=("tile_h", "tile_p"))
def mlp_forward(x, w1, gamma, beta, w2, b2, *, tile_h=None, tile_p=None):
    """Forward pass of Linear -> BatchNorm1d(train) -> ReLU -> Linear."""
    B, F = x.shape
    H = w1.shape[1]
    P = w2.shape[1]

    if tile_h is None or tile_p is None:
        auto_th, auto_tp = _choose_tiles(B, F, H, P)
        tile_h = auto_th if tile_h is None else tile_h
        tile_p = auto_tp if tile_p is None else tile_p
    tile_h = min(tile_h, H)
    tile_p = min(tile_p, P)
    assert H % tile_h == 0 and P % tile_p == 0, "tiles must divide H and P"

    x_bf = x.astype(jnp.bfloat16)   # tiny, fused into this jit

    grid = (P // tile_p, H // tile_h)   # (parallel, reduction) — reduction last

    return pl.pallas_call(
        mlp_kernel,
        out_shape=jax.ShapeDtypeStruct((B, P), jnp.float32),
        grid_spec=pltpu.PrefetchScalarGridSpec(
            num_scalar_prefetch=0,
            grid=grid,
            in_specs=[
                pl.BlockSpec((B, F), lambda p, k: (0, 0)),            # x (resident)
                pl.BlockSpec((F, tile_h), lambda p, k: (0, k)),       # W1 tile (bf16)
                pl.BlockSpec((1, H), lambda p, k: (0, 0)),            # gamma (resident)
                pl.BlockSpec((1, H), lambda p, k: (0, 0)),            # beta (resident)
                pl.BlockSpec((tile_h, tile_p), lambda p, k: (k, p)),  # W2 tile (bf16)
                pl.BlockSpec((1, P), lambda p, k: (0, 0)),            # b2 (resident)
            ],
            # Output block index constant across k -> resident f32 accumulator.
            out_specs=pl.BlockSpec((B, tile_p), lambda p, k: (0, p)),
        ),
        compiler_params=pltpu.CompilerParams(
            dimension_semantics=("parallel", "arbitrary"),
            vmem_limit_bytes=_VMEM_LIMIT_BYTES),
    )(x_bf, w1, gamma, beta, w2, b2)


# --------------------------------------------------------------------------- #
# References
# --------------------------------------------------------------------------- #
def reference_forward_f32(x, w1, b1, gamma, beta, w2, b2):
    """Exact f32 reference of the PyTorch module (training-mode BatchNorm)."""
    h = x @ w1 + b1
    mean = jnp.mean(h, axis=0, keepdims=True)
    var = jnp.mean((h - mean) ** 2, axis=0, keepdims=True)
    h = gamma * (h - mean) * jax.lax.rsqrt(var + BN_EPS) + beta
    h = jnp.maximum(h, 0.0)
    return h @ w2 + b2


def reference_forward_bf16(x, w1, b1, gamma, beta, w2, b2):
    """Same module, using the kernel's bf16-in / f32-accumulate matmuls."""
    h = jnp.dot(x.astype(jnp.bfloat16), w1.astype(jnp.bfloat16),
                preferred_element_type=jnp.float32) + b1
    mean = jnp.mean(h, axis=0, keepdims=True)
    var = jnp.mean((h - mean) ** 2, axis=0, keepdims=True)
    h = gamma * (h - mean) * jax.lax.rsqrt(var + BN_EPS) + beta
    a = jnp.maximum(h, 0.0).astype(jnp.bfloat16)
    return jnp.dot(a, w2.astype(jnp.bfloat16),
                   preferred_element_type=jnp.float32) + b2


# --------------------------------------------------------------------------- #
# Test
# --------------------------------------------------------------------------- #
if __name__ == "__main__":
    # Small shapes consistent with the module (Linear(F->H), BN(H), ReLU,
    # Linear(H->P)).
    B, F, H, P = 8, 128, 512, 256

    key = jax.random.PRNGKey(0)
    kx, kw1, kb1, kg, kbe, kw2, kb2 = jax.random.split(key, 7)

    x = jax.random.normal(kx, (B, F), dtype=jnp.float32)

    # Deterministic synthetic parameters (PyTorch-like small uniform init),
    # already transposed to (in, out).
    w1 = jax.random.uniform(kw1, (F, H), jnp.float32, -0.05, 0.05)
    b1 = jax.random.uniform(kb1, (1, H), jnp.float32, -0.05, 0.05)
    gamma = 1.0 + 0.1 * jax.random.normal(kg, (1, H), jnp.float32)
    beta = 0.1 * jax.random.normal(kbe, (1, H), jnp.float32)
    w2 = jax.random.uniform(kw2, (H, P), jnp.float32, -0.05, 0.05)
    b2 = jax.random.uniform(kb2, (1, P), jnp.float32, -0.05, 0.05)

    # One-time (construction-time) weight preparation: bf16 copies are made
    # here, NOT inside every forward call.
    params = prepare_mlp_params(w1, b1, gamma, beta, w2, b2)

    # Auto-tiled path: for these shapes the grid collapses to (1, 1) — one
    # step, W1 streamed exactly once, no accumulation overhead.
    out = jax.block_until_ready(mlp_forward(x, **params))
    assert out.shape == (B, P)

    # Forced multi-tile path: exercises the hidden-reduction (k) axis and the
    # parallel projection (p) axis with the resident-output accumulation.
    out_tiled = jax.block_until_ready(
        mlp_forward(x, **params, tile_h=256, tile_p=128))
    assert out_tiled.shape == (B, P)

    # Tight check vs. a reference using the same bf16 matmul quantization.
    ref_q = reference_forward_bf16(x, w1, b1, gamma, beta, w2, b2)
    assert jnp.allclose(out, ref_q, atol=1e-3, rtol=1e-3), \
        "mismatch vs bf16-quantized reference (auto tiles)"
    assert jnp.allclose(out_tiled, ref_q, atol=1e-3, rtol=1e-3), \
        "mismatch vs bf16-quantized reference (forced tiles)"

    # Loose check vs. the exact f32 PyTorch-semantics reference (bf16 weight
    # quantization is the only meaningful source of difference).
    ref = reference_forward_f32(x, w1, b1, gamma, beta, w2, b2)
    assert jnp.allclose(out, ref, atol=3e-2, rtol=3e-2), \
        "mismatch vs f32 reference"

    # TODO(synk): eval-mode BatchNorm (running_mean/var) and the running-stat
    # buffer updates are stateful side effects not implemented; this kernel
    # matches the default training-mode forward of a freshly built module.
    print("KERNEL_OK")
</pallas_src>

<mosaic_0001>
module attributes {stable_mosaic.version = 11 : i64} {
  func.func @mlp_kernel(%arg0: i32, %arg1: i32, %arg2: memref<8x128xbf16, #tpu.memory_space<vmem>>, %arg3: memref<128x512xbf16, #tpu.memory_space<vmem>>, %arg4: memref<1x512xf32, #tpu.memory_space<vmem>>, %arg5: memref<1x512xf32, #tpu.memory_space<vmem>>, %arg6: memref<512x256xbf16, #tpu.memory_space<vmem>>, %arg7: memref<1x256xf32, #tpu.memory_space<vmem>>, %arg8: memref<8x256xf32, #tpu.memory_space<vmem>>) attributes {dimension_semantics = [#tpu.dimension_semantics<parallel>, #tpu.dimension_semantics<arbitrary>], iteration_bounds = array<i64: 1, 1>, scalar_prefetch = 0 : i64, scratch_operands = 0 : i64, tpu.core_type = #tpu.core_type<tc>, window_params = [{pipeline_mode = #tpu.pipeline_mode<synchronous>, transform_indices = @transform_0, window_bounds = array<i64: 8, 128>}, {transform_indices = @transform_1, window_bounds = array<i64: 128, 512>}, {pipeline_mode = #tpu.pipeline_mode<synchronous>, transform_indices = @transform_2, window_bounds = array<i64: 1, 512>}, {pipeline_mode = #tpu.pipeline_mode<synchronous>, transform_indices = @transform_3, window_bounds = array<i64: 1, 512>}, {transform_indices = @transform_4, window_bounds = array<i64: 512, 256>}, {pipeline_mode = #tpu.pipeline_mode<synchronous>, transform_indices = @transform_5, window_bounds = array<i64: 1, 256>}, {transform_indices = @transform_6, window_bounds = array<i64: 8, 256>}]} {
    %c0 = arith.constant 0 : index
    %c0_0 = arith.constant 0 : index
    %0 = vector.load %arg2[%c0, %c0_0] : memref<8x128xbf16, #tpu.memory_space<vmem>>, vector<8x128xbf16>
    %c0_1 = arith.constant 0 : index
    %c0_2 = arith.constant 0 : index
    %1 = vector.load %arg3[%c0_1, %c0_2] : memref<128x512xbf16, #tpu.memory_space<vmem>>, vector<128x512xbf16>
    %cst = arith.constant dense<0.000000e+00> : vector<8x512xf32>
    %2 = tpu.matmul %0, %1, %cst {dimension_numbers = #tpu.dot_dimension_numbers<[1], [0], [0], [1], [0, 0, 1, 1], [], []>} : vector<8x128xbf16>, vector<128x512xbf16>, vector<8x512xf32> -> vector<8x512xf32>
    %cst_3 = arith.constant dense<0.000000e+00> : vector<512xf32>
    %3 = vector.multi_reduction <add>, %2, %cst_3 [0] : vector<8x512xf32> to vector<512xf32>
    %4 = vector.shape_cast %3 : vector<512xf32> to vector<1x512xf32>
    %cst_4 = arith.constant 1.250000e-01 : f32
    %5 = vector.broadcast %cst_4 : f32 to vector<1x512xf32>
    %6 = arith.mulf %4, %5 : vector<1x512xf32>
    %7 = arith.mulf %2, %2 : vector<8x512xf32>
    %cst_5 = arith.constant dense<0.000000e+00> : vector<512xf32>
    %8 = vector.multi_reduction <add>, %7, %cst_5 [0] : vector<8x512xf32> to vector<512xf32>
    %9 = vector.shape_cast %8 : vector<512xf32> to vector<1x512xf32>
    %cst_6 = arith.constant 1.250000e-01 : f32
    %10 = vector.broadcast %cst_6 : f32 to vector<1x512xf32>
    %11 = arith.mulf %9, %10 : vector<1x512xf32>
    %12 = arith.mulf %6, %6 : vector<1x512xf32>
    %13 = arith.subf %11, %12 : vector<1x512xf32>
    %cst_7 = arith.constant 0.000000e+00 : f32
    %14 = vector.broadcast %cst_7 : f32 to vector<1x512xf32>
    %15 = arith.maximumf %13, %14 : vector<1x512xf32>
    %c512_i32 = arith.constant 512 : i32
    %16 = arith.muli %arg1, %c512_i32 : i32
    %17 = tpu.assume_multiple %16, 128 : i32
    %c0_8 = arith.constant 0 : index
    %18 = arith.index_cast %17 : i32 to index
    %19 = vector.load %arg4[%c0_8, %18] : memref<1x512xf32, #tpu.memory_space<vmem>>, vector<1x512xf32>
    %c0_9 = arith.constant 0 : index
    %20 = arith.index_cast %17 : i32 to index
    %21 = vector.load %arg5[%c0_9, %20] : memref<1x512xf32, #tpu.memory_space<vmem>>, vector<1x512xf32>
    %cst_10 = arith.constant 9.99999974E-6 : f32
    %22 = vector.broadcast %cst_10 : f32 to vector<1x512xf32>
    %23 = arith.addf %15, %22 : vector<1x512xf32>
    %24 = math.rsqrt %23 : vector<1x512xf32>
    %25 = arith.mulf %19, %24 : vector<1x512xf32>
    %26 = arith.mulf %6, %25 : vector<1x512xf32>
    %27 = arith.subf %21, %26 : vector<1x512xf32>
    %28 = vector.broadcast %25 : vector<1x512xf32> to vector<8x512xf32>
    %29 = arith.mulf %2, %28 : vector<8x512xf32>
    %30 = vector.broadcast %27 : vector<1x512xf32> to vector<8x512xf32>
    %31 = arith.addf %29, %30 : vector<8x512xf32>
    %cst_11 = arith.constant 0.000000e+00 : f32
    %32 = vector.broadcast %cst_11 : f32 to vector<8x512xf32>
    %33 = arith.maximumf %31, %32 : vector<8x512xf32>
    %c256_i32 = arith.constant 256 : i32
    %34 = arith.muli %arg0, %c256_i32 : i32
    %35 = tpu.assume_multiple %34, 128 : i32
    %c0_i32 = arith.constant 0 : i32
    %36 = arith.cmpi eq, %arg1, %c0_i32 : i32
    %37 = arith.extui %36 : i1 to i32
    %c0_i32_12 = arith.constant 0 : i32
    %38 = arith.cmpi ne, %37, %c0_i32_12 : i32
    scf.if %38 {
      %c0_20 = arith.constant 0 : index
      %45 = arith.index_cast %35 : i32 to index
      %46 = vector.load %arg7[%c0_20, %45] : memref<1x256xf32, #tpu.memory_space<vmem>>, vector<1x256xf32>
      %47 = vector.shape_cast %46 : vector<1x256xf32> to vector<1x256xf32>
      %48 = vector.broadcast %47 : vector<1x256xf32> to vector<8x256xf32>
      %c0_21 = arith.constant 0 : index
      %c0_22 = arith.constant 0 : index
      %49 = vector.load %arg8[%c0_21, %c0_22] : memref<8x256xf32, #tpu.memory_space<vmem>>, vector<8x256xf32>
      tpu.vector_store %arg8[%c0_21, %c0_22], %48 {strides = array<i32>} : memref<8x256xf32, #tpu.memory_space<vmem>>, vector<8x256xf32>,
    } else {
    }
    %c0_13 = arith.constant 0 : index
    %c0_14 = arith.constant 0 : index
    %39 = vector.load %arg8[%c0_13, %c0_14] : memref<8x256xf32, #tpu.memory_space<vmem>>, vector<8x256xf32>
    %40 = arith.truncf %33 : vector<8x512xf32> to vector<8x512xbf16>
    %c0_15 = arith.constant 0 : index
    %c0_16 = arith.constant 0 : index
    %41 = vector.load %arg6[%c0_15, %c0_16] : memref<512x256xbf16, #tpu.memory_space<vmem>>, vector<512x256xbf16>
    %cst_17 = arith.constant dense<0.000000e+00> : vector<8x256xf32>
    %42 = tpu.matmul %40, %41, %cst_17 {dimension_numbers = #tpu.dot_dimension_numbers<[1], [0], [0], [1], [0, 0, 1, 1], [], []>} : vector<8x512xbf16>, vector<512x256xbf16>, vector<8x256xf32> -> vector<8x256xf32>
    %43 = arith.addf %39, %42 : vector<8x256xf32>
    %c0_18 = arith.constant 0 : index
    %c0_19 = arith.constant 0 : index
    %44 = vector.load %arg8[%c0_18, %c0_19] : memref<8x256xf32, #tpu.memory_space<vmem>>, vector<8x256xf32>
    tpu.vector_store %arg8[%c0_18, %c0_19], %43 {strides = array<i32>} : memref<8x256xf32, #tpu.memory_space<vmem>>, vector<8x256xf32>,
    return
  }
  func.func @transform_0(%arg0: i32, %arg1: i32) -> (i32, i32) {
    %c0_i32 = arith.constant 0 : i32
    %c0_i32_0 = arith.constant 0 : i32
    %c0_i32_1 = arith.constant 0 : i32
    return %c0_i32, %c0_i32_0 : i32, i32
  }
  func.func @transform_1(%arg0: i32, %arg1: i32) -> (i32, i32) {
    %c0_i32 = arith.constant 0 : i32
    %c0_i32_0 = arith.constant 0 : i32
    return %c0_i32, %arg1 : i32, i32
  }
  func.func @transform_2(%arg0: i32, %arg1: i32) -> (i32, i32) {
    %c0_i32 = arith.constant 0 : i32
    %c0_i32_0 = arith.constant 0 : i32
    %c0_i32_1 = arith.constant 0 : i32
    return %c0_i32, %c0_i32_0 : i32, i32
  }
  func.func @transform_3(%arg0: i32, %arg1: i32) -> (i32, i32) {
    %c0_i32 = arith.constant 0 : i32
    %c0_i32_0 = arith.constant 0 : i32
    %c0_i32_1 = arith.constant 0 : i32
    return %c0_i32, %c0_i32_0 : i32, i32
  }
  func.func @transform_4(%arg0: i32, %arg1: i32) -> (i32, i32) {
    %c0_i32 = arith.constant 0 : i32
    return %arg1, %arg0 : i32, i32
  }
  func.func @transform_5(%arg0: i32, %arg1: i32) -> (i32, i32) {
    %c0_i32 = arith.constant 0 : i32
    %c0_i32_0 = arith.constant 0 : i32
    %c0_i32_1 = arith.constant 0 : i32
    return %c0_i32, %c0_i32_0 : i32, i32
  }
  func.func @transform_6(%arg0: i32, %arg1: i32) -> (i32, i32) {
    %c0_i32 = arith.constant 0 : i32
    %c0_i32_0 = arith.constant 0 : i32
    return %c0_i32, %arg0 : i32, i32
  }
}

</mosaic_0001>

<bundles_post_ra>
// kernel: mlp_forward.1
= control target key start
LH: loop header
LB: loop body
LE: loop exit
PB: predicated region body
PF: predicated region fallthrough
CT: control target
= control target key end

     0   :  { %11 = vsyncpa [#allocation3], 0  ;;  %s1499_s0 = inlined_call_operand.vmem [shape: bf16[8,128], index: 0, kind: input, shape index: {}]   ;;  %s1500_s1 = inlined_call_operand.hbm [shape: bf16[128,512], index: 1, kind: input, shape index: {}]   ;;  %s1501_s2 = inlined_call_operand.vmem [shape: f32[1,512], index: 2, kind: input, shape index: {}]   ;;  %s1502_s3 = inlined_call_operand.vmem [shape: f32[1,512], index: 3, kind: input, shape index: {}]   ;;  %s1503_s4 = inlined_call_operand.hbm [shape: bf16[512,256], index: 4, kind: input, shape index: {}]   ;;  %s1504_s5 = inlined_call_operand.vmem [shape: f32[1,256], index: 5, kind: input, shape index: {}]   ;;  %s1505_s6 = inlined_call_operand.hbm [shape: f32[8,256], index: 6, kind: output, shape index: {}]  }
   0x1   :  { %12 = vsyncpa [#allocation6], 0 }
   0x2   :  { %13 = vsyncpa [#allocation4], 0  ;;  %s1379_s21 = smov [#allocation2]   ;;  %s1307_s25 = scalar_lea.hbm %s1500_s1, 4096 }
   0x3   :  { %s21_s22 = sshll.u32 %s1379_s21, 4  ;;  %p1308_p0 = scmp.ne.s32.totalorder %s1500_s1, %s1307_s25  ;;  %s22_s22 = int_to_ptr.vmem [resolvable:$true] %s21_s22 }
   0x4   :  { %p1311_p1 = scmp.lt.u32.totalorder %s1307_s25, %s1500_s1 }
   0x6   :  { %p1313_p2 = pnand %p1311_p1, %p1308_p0 }
   0x8   :  { %1316 = shalt.err (!%p1313_p2)
}
   0x9   :  { %s1317_s30 = scalar_lea.vmem %s22_s22, 4096  ;;  %p1322_p4 = scmp.lt.s32.totalorder %s22_s22, %s22_s22 }
   0xa   :  { %p1318_p3 = scmp.ne.s32.totalorder %s22_s22, %s1317_s30  ;;  %p1323_p5 = scmp.lt.s32.totalorder %s1317_s30, %s1317_s30 }
   0xc   :  { %p1324_p6 = por %p1323_p5, %p1322_p4 }
   0xe   :  { %p1325_p7 = pnand %p1324_p6, %p1318_p3 }
  0x10   :  { %1328 = shalt.err (!%p1325_p7)
}
  0x11   :  { %s1380_s7 = smov 256   ;;  %s1381_s8 = smov 16  }
  0x12   :  { %27 = dma.hbm_to_vmem [thread:$0]  %s1500_s1, 4096, %s22_s22, [#allocation3], %s1380_s7, %s1380_s7, %s1381_s8  }
  0x13   :  { %s1382_s11 = smov [#allocation5]   ;;  %s1329_s15 = scalar_lea.hbm %s1503_s4, 8192 }
  0x14   :  { %s37_s12 = sshll.u32 %s1382_s11, 4  ;;  %p1330_p8 = scmp.ne.s32.totalorder %s1503_s4, %s1329_s15  ;;  %s38_s12 = int_to_ptr.vmem [resolvable:$true] %s37_s12 }
  0x15   :  { %p1333_p9 = scmp.lt.u32.totalorder %s1329_s15, %s1503_s4 }
  0x17   :  { %p1335_p10 = pnand %p1333_p9, %p1330_p8 }
  0x19   :  { %1338 = shalt.err (!%p1335_p10)
}
  0x1a   :  { %s1339_s20 = scalar_lea.vmem %s38_s12, 8192  ;;  %p1344_p12 = scmp.lt.s32.totalorder %s38_s12, %s38_s12 }
  0x1b   :  { %p1340_p11 = scmp.ne.s32.totalorder %s38_s12, %s1339_s20  ;;  %p1345_p13 = scmp.lt.s32.totalorder %s1339_s20, %s1339_s20 }
  0x1d   :  { %p1346_p0 = por %p1345_p13, %p1344_p12 }
  0x1f   :  { %p1347_p1 = pnand %p1346_p0, %p1340_p11 }
  0x21   :  { %1350 = shalt.err (!%p1347_p1)
}
  0x22   :  { %s1383_s1 = smov 128   ;;  %s1384_s21 = smov 8  }
  0x23   :  { %43 = dma.hbm_to_vmem [thread:$0]  %s1503_s4, 8192, %s38_s12, [#allocation6], %s1383_s1, %s1383_s1, %s1384_s21  }
  0x24   :  { %1373 = dma.done.wait [#allocation3], 4096  }
  0x25   :  { %1374 = vsyncadd [#allocation3], 4294963200 }
  0x26   :  { %1375 = dma.done.wait [#allocation6], 8192  }
  0x27   :  { %1376 = vsyncadd [#allocation6], 4294959104  ;;  %v1385_v0 = vmov 0   ;;  %v1155_v1 = vld [vmem:[#allocation2 + $0x4] ss:$16 sps:$4 sm:$0xff]   ;;  %s1387_s28 = smov [#allocation7]  }
  0x28   :  { %278 = vmatprep.mubr.bf16.mxu0 %v1385_v0  ;;  %319 = vmatprep.mubr.bf16.mxu1 %v1385_v0  ;;  %v1157_v2 = vld [vmem:[#allocation2 + $0xc] ss:$16 sps:$4 sm:$0xff]   ;;  %v1159_v3 = vld [vmem:[#allocation2] ss:$16 sps:$4 sm:$0xff]   ;;  %v1160_v4 = vld [vmem:[#allocation2 + $0x8] ss:$16 sps:$4 sm:$0xff]  }
  0x29   :  { %246 = vmatprep.subr.bf16.mxu0 %v1155_v1  ;;  %287 = vmatprep.subr.bf16.mxu1 %v1157_v2  ;;  %v1161_v5 = vld [vmem:[#allocation2 + $0x24] ss:$16 sps:$4 sm:$0xff]   ;;  %v1163_v6 = vld [vmem:[#allocation2 + $0x2c] ss:$16 sps:$4 sm:$0xff]   ;;  %v1165_v7 = vld [vmem:[#allocation2 + $0x20] ss:$16 sps:$4 sm:$0xff]  }
  0x2a   :  { %247 = vmatpush1.bf16.msra.mxu0 %v1159_v3  ;;  %288 = vmatpush1.bf16.msra.mxu1 %v1160_v4  ;;  %v1166_v8 = vld [vmem:[#allocation2 + $0x28] ss:$16 sps:$4 sm:$0xff]   ;;  %v1167_v9 = vld [vmem:[#allocation2 + $0x44] ss:$16 sps:$4 sm:$0xff]   ;;  %v1169_v10 = vld [vmem:[#allocation2 + $0x4c] ss:$16 sps:$4 sm:$0xff]  }
  0x2b   :  { %248 = vmatprep.subr.bf16.mxu0 %v1161_v5  ;;  %289 = vmatprep.subr.bf16.mxu1 %v1163_v6  ;;  %v1171_v11 = vld [vmem:[#allocation2 + $0x40] ss:$16 sps:$4 sm:$0xff]   ;;  %v1172_v12 = vld [vmem:[#allocation2 + $0x48] ss:$16 sps:$4 sm:$0xff]   ;;  %v1173_v13 = vld [vmem:[#allocation2 + $0x64] ss:$16 sps:$4 sm:$0xff]  }
  0x2c   :  { %v1175_v14 = vld [vmem:[#allocation2 + $0x6c] ss:$16 sps:$4 sm:$0xff]   ;;  %v1177_v15 = vld [vmem:[#allocation2 + $0x60] ss:$16 sps:$4 sm:$0xff]   ;;  %v1178_v16 = vld [vmem:[#allocation2 + $0x68] ss:$16 sps:$4 sm:$0xff]  }
  0x2d   :  { %v1179_v17 = vld [vmem:[#allocation2 + $0x84] ss:$16 sps:$4 sm:$0xff]   ;;  %v1181_v18 = vld [vmem:[#allocation2 + $0x8c] ss:$16 sps:$4 sm:$0xff]   ;;  %v1183_v19 = vld [vmem:[#allocation2 + $0x80] ss:$16 sps:$4 sm:$0xff]  }
  0x2e   :  { %249 = vmatpush1.bf16.msra.mxu0 %v1165_v7  ;;  %290 = vmatpush1.bf16.msra.mxu1 %v1166_v8  ;;  %v1184_v20 = vld [vmem:[#allocation2 + $0x88] ss:$16 sps:$4 sm:$0xff]   ;;  %v1185_v21 = vld [vmem:[#allocation2 + $0xa4] ss:$16 sps:$4 sm:$0xff]   ;;  %v1187_v22 = vld [vmem:[#allocation2 + $0xac] ss:$16 sps:$4 sm:$0xff]  }
  0x2f   :  { %250 = vmatprep.subr.bf16.mxu0 %v1167_v9  ;;  %291 = vmatprep.subr.bf16.mxu1 %v1169_v10  ;;  %v1189_v23 = vld [vmem:[#allocation2 + $0xa0] ss:$16 sps:$4 sm:$0xff]   ;;  %v1190_v24 = vld [vmem:[#allocation2 + $0xa8] ss:$16 sps:$4 sm:$0xff]   ;;  %v1191_v25 = vld [vmem:[#allocation2 + $0xc4] ss:$16 sps:$4 sm:$0xff]  }
  0x30   :  { %v1193_v26 = vld [vmem:[#allocation2 + $0xcc] ss:$16 sps:$4 sm:$0xff]   ;;  %v1195_v27 = vld [vmem:[#allocation2 + $0xc0] ss:$16 sps:$4 sm:$0xff]   ;;  %v1196_v28 = vld [vmem:[#allocation2 + $0xc8] ss:$16 sps:$4 sm:$0xff]  }
  0x31   :  { %v1197_v29 = vld [vmem:[#allocation2 + $0xe4] ss:$16 sps:$4 sm:$0xff]   ;;  %v1199_v30 = vld [vmem:[#allocation2 + $0xec] ss:$16 sps:$4 sm:$0xff]   ;;  %v1201_v31 = vld [vmem:[#allocation2 + $0xe0] ss:$16 sps:$4 sm:$0xff]  }
  0x32   :  { %251 = vmatpush1.bf16.msra.mxu0 %v1171_v11  ;;  %292 = vmatpush1.bf16.msra.mxu1 %v1172_v12  ;;  %v1202_v32 = vld [vmem:[#allocation2 + $0xe8] ss:$16 sps:$4 sm:$0xff]   ;;  %v53_v33 = vld [vmem:[%s1499_s0] sm:$0xf]  ;;  %v1205_v34 = vld [vmem:[#allocation5 + $0x4] ss:$8 sps:$4 sm:$0xff]  }
  0x33   :  { %252 = vmatprep.subr.bf16.mxu0 %v1173_v13  ;;  %293 = vmatprep.subr.bf16.mxu1 %v1175_v14  ;;  %v1208_v35 = vld [vmem:[#allocation5 + $0x104] ss:$8 sps:$4 sm:$0xff]   ;;  %v1203_v36 = vld [vmem:[#allocation5] ss:$8 sps:$4 sm:$0xff]   ;;  %v1211_v38 = vld [vmem:[#allocation5 + $0x14] ss:$8 sps:$4 sm:$0xff]  }
  0x34   :  { %v1206_v37 = vld [vmem:[#allocation5 + $0x100] ss:$8 sps:$4 sm:$0xff]   ;;  %v1214_v39 = vld [vmem:[#allocation5 + $0x114] ss:$8 sps:$4 sm:$0xff]   ;;  %v1209_v40 = vld [vmem:[#allocation5 + $0x10] ss:$8 sps:$4 sm:$0xff]  }
  0x35   :  { %v1212_v41 = vld [vmem:[#allocation5 + $0x110] ss:$8 sps:$4 sm:$0xff]   ;;  %v1217_v42 = vld [vmem:[#allocation5 + $0x24] ss:$8 sps:$4 sm:$0xff]   ;;  %v1215_v44 = vld [vmem:[#allocation5 + $0x20] ss:$8 sps:$4 sm:$0xff]  }
  0x36   :  { %253 = vmatpush1.bf16.msra.mxu0 %v1177_v15  ;;  %294 = vmatpush1.bf16.msra.mxu1 %v1178_v16  ;;  %v1220_v43 = vld [vmem:[#allocation5 + $0x124] ss:$8 sps:$4 sm:$0xff]   ;;  %v1218_v45 = vld [vmem:[#allocation5 + $0x120] ss:$8 sps:$4 sm:$0xff]   ;;  %v1223_v46 = vld [vmem:[#allocation5 + $0x34] ss:$8 sps:$4 sm:$0xff]  }
  0x37   :  { %254 = vmatprep.subr.bf16.mxu0 %v1179_v17  ;;  %295 = vmatprep.subr.bf16.mxu1 %v1181_v18  ;;  %v1226_v47 = vld [vmem:[#allocation5 + $0x134] ss:$8 sps:$4 sm:$0xff]   ;;  %v1221_v48 = vld [vmem:[#allocation5 + $0x30] ss:$8 sps:$4 sm:$0xff]   ;;  %v1229_v50 = vld [vmem:[#allocation5 + $0x44] ss:$8 sps:$4 sm:$0xff]  }
  0x38   :  { %v1224_v49 = vld [vmem:[#allocation5 + $0x130] ss:$8 sps:$4 sm:$0xff]   ;;  %v1232_v51 = vld [vmem:[#allocation5 + $0x144] ss:$8 sps:$4 sm:$0xff]   ;;  %v1227_v52 = vld [vmem:[#allocation5 + $0x40] ss:$8 sps:$4 sm:$0xff]  }
  0x39   :  { %v1230_v53 = vld [vmem:[#allocation5 + $0x140] ss:$8 sps:$4 sm:$0xff]   ;;  %v1235_v54 = vld [vmem:[#allocation5 + $0x54] ss:$8 sps:$4 sm:$0xff]   ;;  %v1233_v56 = vld [vmem:[#allocation5 + $0x50] ss:$8 sps:$4 sm:$0xff]  }
  0x3a   :  { %255 = vmatpush1.bf16.msra.mxu0 %v1183_v19  ;;  %296 = vmatpush1.bf16.msra.mxu1 %v1184_v20  ;;  %v1238_v55 = vld [vmem:[#allocation5 + $0x154] ss:$8 sps:$4 sm:$0xff]   ;;  %v1236_v57 = vld [vmem:[#allocation5 + $0x150] ss:$8 sps:$4 sm:$0xff]   ;;  %v1241_v58 = vld [vmem:[#allocation5 + $0x64] ss:$8 sps:$4 sm:$0xff]  }
  0x3b   :  { %256 = vmatprep.subr.bf16.mxu0 %v1185_v21  ;;  %297 = vmatprep.subr.bf16.mxu1 %v1187_v22  ;;  %v1244_v59 = vld [vmem:[#allocation5 + $0x164] ss:$8 sps:$4 sm:$0xff]   ;;  %v1239_v60 = vld [vmem:[#allocation5 + $0x60] ss:$8 sps:$4 sm:$0xff]   ;;  %v1247_v62 = vld [vmem:[#allocation5 + $0x74] ss:$8 sps:$4 sm:$0xff]  }
  0x3c   :  { %v1242_v61 = vld [vmem:[#allocation5 + $0x160] ss:$8 sps:$4 sm:$0xff]   ;;  %v1250_v63 = vld [vmem:[#allocation5 + $0x174] ss:$8 sps:$4 sm:$0xff]   ;;  %v1245_v0 = vld [vmem:[#allocation5 + $0x70] ss:$8 sps:$4 sm:$0xff]  }
  0x3d   :  { %v1248_v1 = vld [vmem:[#allocation5 + $0x170] ss:$8 sps:$4 sm:$0xff]   ;;  %v1253_v2 = vld [vmem:[#allocation5 + $0x84] ss:$8 sps:$4 sm:$0xff]   ;;  %v1251_v4 = vld [vmem:[#allocation5 + $0x80] ss:$8 sps:$4 sm:$0xff]  }
  0x3e   :  { %257 = vmatpush1.bf16.msra.mxu0 %v1189_v23  ;;  %298 = vmatpush1.bf16.msra.mxu1 %v1190_v24  ;;  %v1256_v3 = vld [vmem:[#allocation5 + $0x184] ss:$8 sps:$4 sm:$0xff]   ;;  %v1254_v5 = vld [vmem:[#allocation5 + $0x180] ss:$8 sps:$4 sm:$0xff]   ;;  %v1259_v6 = vld [vmem:[#allocation5 + $0x94] ss:$8 sps:$4 sm:$0xff]  }
  0x3f   :  { %258 = vmatprep.subr.bf16.mxu0 %v1191_v25  ;;  %299 = vmatprep.subr.bf16.mxu1 %v1193_v26  ;;  %v1262_v7 = vld [vmem:[#allocation5 + $0x194] ss:$8 sps:$4 sm:$0xff]   ;;  %v1257_v8 = vld [vmem:[#allocation5 + $0x90] ss:$8 sps:$4 sm:$0xff]   ;;  %v1265_v10 = vld [vmem:[#allocation5 + $0xa4] ss:$8 sps:$4 sm:$0xff]  }
  0x40   :  { %v1260_v9 = vld [vmem:[#allocation5 + $0x190] ss:$8 sps:$4 sm:$0xff]   ;;  %v1268_v11 = vld [vmem:[#allocation5 + $0x1a4] ss:$8 sps:$4 sm:$0xff]   ;;  %v1263_v12 = vld [vmem:[#allocation5 + $0xa0] ss:$8 sps:$4 sm:$0xff]  }
  0x41   :  { %v1266_v13 = vld [vmem:[#allocation5 + $0x1a0] ss:$8 sps:$4 sm:$0xff]   ;;  %v1271_v14 = vld [vmem:[#allocation5 + $0xb4] ss:$8 sps:$4 sm:$0xff]   ;;  %v1269_v16 = vld [vmem:[#allocation5 + $0xb0] ss:$8 sps:$4 sm:$0xff]  }
  0x42   :  { %259 = vmatpush1.bf16.msra.mxu0 %v1195_v27  ;;  %300 = vmatpush1.bf16.msra.mxu1 %v1196_v28  ;;  %v1274_v15 = vld [vmem:[#allocation5 + $0x1b4] ss:$8 sps:$4 sm:$0xff]   ;;  %v1272_v17 = vld [vmem:[#allocation5 + $0x1b0] ss:$8 sps:$4 sm:$0xff]   ;;  %v1277_v18 = vld [vmem:[#allocation5 + $0xc4] ss:$8 sps:$4 sm:$0xff]  }
  0x43   :  { %260 = vmatprep.subr.bf16.mxu0 %v1197_v29  ;;  %301 = vmatprep.subr.bf16.mxu1 %v1199_v30  ;;  %v1280_v19 = vld [vmem:[#allocation5 + $0x1c4] ss:$8 sps:$4 sm:$0xff]   ;;  %v1275_v20 = vld [vmem:[#allocation5 + $0xc0] ss:$8 sps:$4 sm:$0xff]   ;;  %v1283_v22 = vld [vmem:[#allocation5 + $0xd4] ss:$8 sps:$4 sm:$0xff]  }
  0x44   :  { %v1278_v21 = vld [vmem:[#allocation5 + $0x1c0] ss:$8 sps:$4 sm:$0xff]   ;;  %v1286_v23 = vld [vmem:[#allocation5 + $0x1d4] ss:$8 sps:$4 sm:$0xff]   ;;  %v1281_v24 = vld [vmem:[#allocation5 + $0xd0] ss:$8 sps:$4 sm:$0xff]  }
  0x45   :  { %v1284_v25 = vld [vmem:[#allocation5 + $0x1d0] ss:$8 sps:$4 sm:$0xff]   ;;  %v1289_v26 = vld [vmem:[#allocation5 + $0xe4] ss:$8 sps:$4 sm:$0xff]   ;;  %v1287_v28 = vld [vmem:[#allocation5 + $0xe0] ss:$8 sps:$4 sm:$0xff]  }
  0x46   :  { %261 = vmatpush1.bf16.msra.mxu0 %v1201_v31  ;;  %302 = vmatpush1.bf16.msra.mxu1 %v1202_v32  ;;  %v1292_v27 = vld [vmem:[#allocation5 + $0x1e4] ss:$8 sps:$4 sm:$0xff]   ;;  %v1290_v29 = vld [vmem:[#allocation5 + $0x1e0] ss:$8 sps:$4 sm:$0xff]   ;;  %v1295_v30 = vld [vmem:[#allocation5 + $0xf4] ss:$8 sps:$4 sm:$0xff]  }
  0x47   :  { %945 = vmatprep.subr.bf16.mxu0 %v1205_v34  ;;  %986 = vmatprep.subr.bf16.mxu1 %v1208_v35  ;;  %v1298_v31 = vld [vmem:[#allocation5 + $0x1f4] ss:$8 sps:$4 sm:$0xff]   ;;  %v1293_v32 = vld [vmem:[#allocation5 + $0xf0] ss:$8 sps:$4 sm:$0xff]   ;;  %s1037_s29 = sshll.u32 %s1387_s28, 4  ;;  %s1038_s29 = int_to_ptr.vmem [resolvable:$true] %s1037_s29 }
  0x48   :  { %p1356_p3 = scmp.lt.s32.totalorder %s1038_s29, %s1038_s29 }
  0x49   :  { %279 = vmatmul.mubr.bf16.vlgmr.msra.gmra.mrb[0].mxu0 %v53_v33  ;;  %320 = vmatmul.mubr.bf16.vlgmr.msra.gmra.mrb[0].mxu1 %v53_v33  ;;  %v1296_v33 = vld [vmem:[#allocation5 + $0x1f0] ss:$8 sps:$4 sm:$0xff]  }
  0x4a   :  { %946 = vmatpush1.bf16.msra.mxu0 %v1203_v36  ;;  %987 = vmatpush1.bf16.msra.mxu1 %v1206_v37 }
  0x4b   :  { %947 = vmatprep.subr.bf16.mxu0 %v1211_v38  ;;  %988 = vmatprep.subr.bf16.mxu1 %v1214_v39 }
  0x4e   :  { %948 = vmatpush1.bf16.msra.mxu0 %v1209_v40  ;;  %989 = vmatpush1.bf16.msra.mxu1 %v1212_v41 }
  0x4f   :  { %949 = vmatprep.subr.bf16.mxu0 %v1217_v42  ;;  %990 = vmatprep.subr.bf16.mxu1 %v1220_v43 }
  0x52   :  { %950 = vmatpush1.bf16.msra.mxu0 %v1215_v44  ;;  %991 = vmatpush1.bf16.msra.mxu1 %v1218_v45 }
  0x53   :  { %951 = vmatprep.subr.bf16.mxu0 %v1223_v46  ;;  %992 = vmatprep.subr.bf16.mxu1 %v1226_v47 }
  0x56   :  { %952 = vmatpush1.bf16.msra.mxu0 %v1221_v48  ;;  %993 = vmatpush1.bf16.msra.mxu1 %v1224_v49 }
  0x57   :  { %953 = vmatprep.subr.bf16.mxu0 %v1229_v50  ;;  %994 = vmatprep.subr.bf16.mxu1 %v1232_v51 }
  0x5a   :  { %954 = vmatpush1.bf16.msra.mxu0 %v1227_v52  ;;  %995 = vmatpush1.bf16.msra.mxu1 %v1230_v53 }
  0x5b   :  { %955 = vmatprep.subr.bf16.mxu0 %v1235_v54  ;;  %996 = vmatprep.subr.bf16.mxu1 %v1238_v55 }
  0x5e   :  { %956 = vmatpush1.bf16.msra.mxu0 %v1233_v56  ;;  %997 = vmatpush1.bf16.msra.mxu1 %v1236_v57 }
  0x5f   :  { %957 = vmatprep.subr.bf16.mxu0 %v1241_v58  ;;  %998 = vmatprep.subr.bf16.mxu1 %v1244_v59 }
  0x62   :  { %958 = vmatpush1.bf16.msra.mxu0 %v1239_v60  ;;  %999 = vmatpush1.bf16.msra.mxu1 %v1242_v61 }
  0x63   :  { %959 = vmatprep.subr.bf16.mxu0 %v1247_v62  ;;  %1000 = vmatprep.subr.bf16.mxu1 %v1250_v63 }
  0x66   :  { %960 = vmatpush1.bf16.msra.mxu0 %v1245_v0  ;;  %1001 = vmatpush1.bf16.msra.mxu1 %v1248_v1 }
  0x67   :  { %961 = vmatprep.subr.bf16.mxu0 %v1253_v2  ;;  %1002 = vmatprep.subr.bf16.mxu1 %v1256_v3 }
  0x6a   :  { %962 = vmatpush1.bf16.msra.mxu0 %v1251_v4  ;;  %1003 = vmatpush1.bf16.msra.mxu1 %v1254_v5 }
  0x6b   :  { %963 = vmatprep.subr.bf16.mxu0 %v1259_v6  ;;  %1004 = vmatprep.subr.bf16.mxu1 %v1262_v7 }
  0x6e   :  { %964 = vmatpush1.bf16.msra.mxu0 %v1257_v8  ;;  %1005 = vmatpush1.bf16.msra.mxu1 %v1260_v9 }
  0x6f   :  { %965 = vmatprep.subr.bf16.mxu0 %v1265_v10  ;;  %1006 = vmatprep.subr.bf16.mxu1 %v1268_v11 }
  0x72   :  { %966 = vmatpush1.bf16.msra.mxu0 %v1263_v12  ;;  %1007 = vmatpush1.bf16.msra.mxu1 %v1266_v13 }
  0x73   :  { %967 = vmatprep.subr.bf16.mxu0 %v1271_v14  ;;  %1008 = vmatprep.subr.bf16.mxu1 %v1274_v15 }
  0x76   :  { %968 = vmatpush1.bf16.msra.mxu0 %v1269_v16  ;;  %1009 = vmatpush1.bf16.msra.mxu1 %v1272_v17 }
  0x77   :  { %969 = vmatprep.subr.bf16.mxu0 %v1277_v18  ;;  %1010 = vmatprep.subr.bf16.mxu1 %v1280_v19 }
  0x7a   :  { %970 = vmatpush1.bf16.msra.mxu0 %v1275_v20  ;;  %1011 = vmatpush1.bf16.msra.mxu1 %v1278_v21 }
  0x7b   :  { %971 = vmatprep.subr.bf16.mxu0 %v1283_v22  ;;  %1012 = vmatprep.subr.bf16.mxu1 %v1286_v23 }
  0x7e   :  { %972 = vmatpush1.bf16.msra.mxu0 %v1281_v24  ;;  %1013 = vmatpush1.bf16.msra.mxu1 %v1284_v25 }
  0x7f   :  { %973 = vmatprep.subr.bf16.mxu0 %v1289_v26  ;;  %1014 = vmatprep.subr.bf16.mxu1 %v1292_v27 }
  0x82   :  { %974 = vmatpush1.bf16.msra.mxu0 %v1287_v28  ;;  %1015 = vmatpush1.bf16.msra.mxu1 %v1290_v29 }
  0x83   :  { %975 = vmatprep.subr.bf16.mxu0 %v1295_v30  ;;  %1016 = vmatprep.subr.bf16.mxu1 %v1298_v31 }
  0x86   :  { %976 = vmatpush1.bf16.msra.mxu0 %v1293_v32  ;;  %1017 = vmatpush1.bf16.msra.mxu1 %v1296_v33 }
 0x11c   :  { %v1450_v34 = vpop.f32.mrb[0].mxu0  ;;  %v1452_v35 = vpop.f32.mrb[0].mxu1 }
 0x11d   :  { %v328_v36 = vrot.slane %v1450_v34, 4  ;;  %v356_v37 = vmul.f32 %v1450_v34, %v1450_v34  ;;  %v340_v38 = vrot.slane %v1452_v35, 4  ;;  %v358_v39 = vmul.f32 %v1452_v35, %v1452_v35  ;;  %v1460_v40 = vpop.f32.mrb[1].mxu0  ;;  %v1462_v41 = vpop.f32.mrb[1].mxu1 }
 0x11e   :  { %v334_v42 = vrot.slane %v1460_v40, 4  ;;  %v357_v43 = vmul.f32 %v1460_v40, %v1460_v40  ;;  %v346_v44 = vrot.slane %v1462_v41, 4  ;;  %v359_v45 = vmul.f32 %v1462_v41, %v1462_v41  ;;  %v284_v46 = vpop.f32.mrb[2].mxu0  ;;  %v325_v47 = vpop.f32.mrb[2].mxu1 }
 0x11f   :  { %v329_v48 = vadd.f32 %v328_v36, %v1450_v34  ;;  %v360_v49 = vrot.slane %v356_v37, 4  ;;  %v341_v50 = vadd.f32 %v340_v38, %v1452_v35  ;;  %v372_v51 = vrot.slane %v358_v39, 4  ;;  %v285_v52 = vpop.f32.mrb[3].mxu0  ;;  %v326_v53 = vpop.f32.mrb[3].mxu1 }
 0x120   :  { %v335_v54 = vadd.f32 %v334_v42, %v1460_v40  ;;  %v366_v55 = vrot.slane %v357_v43, 4  ;;  %v347_v56 = vadd.f32 %v346_v44, %v1462_v41  ;;  %v378_v57 = vrot.slane %v359_v45, 4 }
 0x121   :  { %v330_v58 = vrot.slane %v329_v48, 2  ;;  %v361_v59 = vadd.f32 %v360_v49, %v356_v37  ;;  %v342_v60 = vrot.slane %v341_v50, 2  ;;  %v373_v61 = vadd.f32 %v372_v51, %v358_v39 }
 0x122   :  { %v336_v62 = vrot.slane %v335_v54, 2  ;;  %v367_v63 = vadd.f32 %v366_v55, %v357_v43  ;;  %v348_v0 = vrot.slane %v347_v56, 2  ;;  %v379_v1 = vadd.f32 %v378_v57, %v359_v45 }
 0x123   :  { %v331_v2 = vadd.f32 %v330_v58, %v329_v48  ;;  %v362_v3 = vrot.slane %v361_v59, 2  ;;  %v343_v4 = vadd.f32 %v342_v60, %v341_v50  ;;  %v374_v5 = vrot.slane %v373_v61, 2 }
 0x124   :  { %v337_v6 = vadd.f32 %v336_v62, %v335_v54  ;;  %v368_v7 = vrot.slane %v367_v63, 2  ;;  %v349_v8 = vadd.f32 %v348_v0, %v347_v56  ;;  %v380_v9 = vrot.slane %v379_v1, 2 }
 0x125   :  { %v332_v10 = vrot.slane %v331_v2, 1  ;;  %v363_v11 = vadd.f32 %v362_v3, %v361_v59  ;;  %v344_v12 = vrot.slane %v343_v4, 1  ;;  %v375_v13 = vadd.f32 %v374_v5, %v373_v61 }
 0x126   :  { %v338_v14 = vrot.slane %v337_v6, 1  ;;  %v369_v15 = vadd.f32 %v368_v7, %v367_v63  ;;  %v350_v16 = vrot.slane %v349_v8, 1  ;;  %v381_v17 = vadd.f32 %v380_v9, %v379_v1  ;;  %v404_v9 = vld [vmem:[%s1501_s2] sm:$0xf] }
 0x127   :  { %v333_v18 = vadd.f32 %v332_v10, %v331_v2  ;;  %v364_v19 = vrot.slane %v363_v11, 1  ;;  %v345_v20 = vadd.f32 %v344_v12, %v343_v4  ;;  %v376_v21 = vrot.slane %v375_v13, 1 }
 0x128   :  { %v339_v22 = vadd.f32 %v338_v14, %v337_v6  ;;  %v370_v23 = vrot.slane %v369_v15, 1  ;;  %v351_v24 = vadd.f32 %v350_v16, %v349_v8  ;;  %v382_v25 = vrot.slane %v381_v17, 1 }
 0x129   :  { %v352_v26 = vmul.f32 0.125, %v333_v18  ;;  %v365_v27 = vadd.f32 %v364_v19, %v363_v11  ;;  %v354_v28 = vmul.f32 0.125, %v345_v20  ;;  %v377_v29 = vadd.f32 %v376_v21, %v375_v13 }
 0x12a   :  { %v353_v30 = vmul.f32 0.125, %v339_v22  ;;  %v371_v31 = vadd.f32 %v370_v23, %v369_v15  ;;  %v355_v32 = vmul.f32 0.125, %v351_v24  ;;  %v383_v33 = vadd.f32 %v382_v25, %v381_v17 }
 0x12b   :  { %v384_v36 = vmul.f32 0.125, %v365_v27  ;;  %v388_v37 = vmul.f32 %v352_v26, %v352_v26  ;;  %v386_v38 = vmul.f32 0.125, %v377_v29  ;;  %v390_v39 = vmul.f32 %v354_v28, %v354_v28 }
 0x12c   :  { %v385_v42 = vmul.f32 0.125, %v371_v31  ;;  %v389_v43 = vmul.f32 %v353_v30, %v353_v30  ;;  %v387_v44 = vmul.f32 0.125, %v383_v33  ;;  %v391_v45 = vmul.f32 %v355_v32, %v355_v32 }
 0x12d   :  { %v392_v46 = vsub.f32 %v384_v36, %v388_v37  ;;  %v394_v47 = vsub.f32 %v386_v38, %v390_v39  ;;  %v1386_v58 = vmov 1966171168   ;;  %v424_v60 = vlaneseq }
 0x12e   :  { %v393_v48 = vsub.f32 %v385_v42, %v389_v43  ;;  %v395_v49 = vsub.f32 %v387_v44, %v391_v45  ;;  %v422_v59 = vunpack.c.l.s4 %v1386_v58 }
 0x12f   :  { %v396_v50 = vmax.f32 %v392_v46, 0.0  ;;  %v398_v51 = vmax.f32 %v394_v47, 0.0  ;;  %v425_v62 = vshrl.u32 %v424_v60, 7 }
 0x130   :  { %v397_v52 = vmax.f32 %v393_v48, 0.0  ;;  %v399_v53 = vmax.f32 %v395_v49, 0.0  ;;  %v423_v61 = vunpack.c.0.s8 %v422_v59 }
 0x131   :  { %v407_v54 = vadd.f32 1e-05, %v396_v50  ;;  %v409_v55 = vadd.f32 1e-05, %v398_v51  ;;  %v456_v10 = vsub.s32 2, %v425_v62  ;;  %v460_v12 = vsub.s32 3, %v425_v62 }
 0x132   :  { %v408_v56 = vadd.f32 1e-05, %v397_v52  ;;  %v410_v57 = vadd.f32 1e-05, %v399_v53  ;;  %v426_v1 = vsub.s32 %v423_v61, %v425_v62  ;;  %v448_v13 = vsub.s32 0, %v425_v62 }
 0x133   :  { %1299 = vrsqrt.f32 %v407_v54  ;;  %v452_v14 = vsub.s32 1, %v425_v62  ;;  %v541_v52 = vld [vmem:[%s1504_s5] sm:$0x3]  ;;  %s1351_s5 = scalar_lea.vmem %s1038_s29, 256 }
 0x134   :  { %1301 = vrsqrt.f32 %v409_v55  ;;  %v546_v53 = vrot.slane %v541_v52, %v448_v13  ;;  %p1352_p2 = scmp.ne.s32.totalorder %s1038_s29, %s1351_s5  ;;  %p1357_p4 = scmp.lt.s32.totalorder %s1351_s5, %s1351_s5 }
 0x135   :  { %1303 = vrsqrt.f32 %v408_v56  ;;  %v550_v56 = vrot.slane %v541_v52, %v452_v14 }
 0x136   :  { %1305 = vrsqrt.f32 %v410_v57  ;;  %p1358_p5 = por %p1357_p4, %p1356_p3 }
 0x138   :  { %p1359_p6 = pnand %p1358_p5, %p1352_p2 }
 0x13d   :  { %v1300_v63 = vpop.eup %1299 }
 0x13e   :  { %v1302_v0 = vpop.eup %1301 }
 0x13f   :  { %v1304_v2 = vpop.eup %1303 }
 0x140   :  { %v1306_v3 = vpop.eup %1305  ;;  %v419_v4 = vcombine.low %v1300_v63, %v1304_v2 }
 0x141   :  { %v420_v5 = vcombine.low %v1302_v0, %v1306_v3 }
 0x142   :  { %v427_v6 = vrot.slane %v419_v4, %v426_v1 }
 0x143   :  { %v434_v7 = vrot.slane %v420_v5, %v426_v1 }
 0x145   :  { %v435_v8 = vcombine.low %v427_v6, %v434_v7 }
 0x147   :  { %v442_v11 = vrot.slane %v435_v8, %v426_v1 }
 0x149   :  { %v444_v15 = vmul.f32 %v442_v11, %v404_v9 }
 0x14b   :  { %v457_v16 = vrot.slane %v444_v15, %v456_v10  ;;  %v461_v17 = vrot.slane %v444_v15, %v460_v12  ;;  %v449_v18 = vrot.slane %v444_v15, %v448_v13  ;;  %v453_v19 = vrot.slane %v444_v15, %v452_v14 }
 0x14d   :  { %v468_v20 = vmul.f32 %v457_v16, %v354_v28  ;;  %v469_v21 = vmul.f32 %v461_v17, %v355_v32  ;;  %v503_v22 = vmul.f32 %v461_v17, %v1462_v41  ;;  %v466_v23 = vmul.f32 %v449_v18, %v352_v26  ;;  %v406_v28 = vld [vmem:[%s1502_s3] sm:$0xf] }
 0x14e   :  { %v467_v24 = vmul.f32 %v453_v19, %v353_v30  ;;  %v501_v25 = vmul.f32 %v453_v19, %v1460_v40  ;;  %v500_v27 = vmul.f32 %v449_v18, %v1450_v34  ;;  %v502_v29 = vmul.f32 %v457_v16, %v1452_v35 }
 0x14f   :  { %v475_v31 = vcombine.low %v468_v20, %v469_v21 }
 0x150   :  { %v474_v33 = vcombine.low %v466_v23, %v467_v24 }
 0x151   :  { %v489_v36 = vrot.slane %v475_v31, %v426_v1 }
 0x152   :  { %v482_v37 = vrot.slane %v474_v33, %v426_v1 }
 0x154   :  { %v490_v38 = vcombine.low %v482_v37, %v489_v36 }
 0x156   :  { %v497_v32 = vrot.slane %v490_v38, %v426_v1 }
 0x158   :  { %v499_v39 = vsub.f32 %v406_v28, %v497_v32 }
 0x15a   :  { %v512_v41 = vrot.slane %v499_v39, %v452_v14  ;;  %v520_v26 = vrot.slane %v499_v39, %v460_v12  ;;  %v508_v30 = vrot.slane %v499_v39, %v448_v13  ;;  %v516_v42 = vrot.slane %v499_v39, %v456_v10 }
 0x15c   :  { %v526_v40 = vadd.f32 %v512_v41, %v501_v25  ;;  %v528_v43 = vadd.f32 %v520_v26, %v503_v22  ;;  %v525_v34 = vadd.f32 %v508_v30, %v500_v27  ;;  %v527_v44 = vadd.f32 %v516_v42, %v502_v29 }
 0x15e   :  { %v530_v35 = vmax.f32 %v526_v40, 0.0  ;;  %v532_v45 = vmax.f32 %v528_v43, 0.0  ;;  %v529_v46 = vmax.f32 %v525_v34, 0.0  ;;  %v531_v47 = vmax.f32 %v527_v44, 0.0 }
 0x160   :  { %v558_v48 = vpack.c.bf16 %v530_v35, %v530_v35  ;;  %v560_v49 = vpack.c.bf16 %v532_v45, %v532_v45  ;;  %v557_v50 = vpack.c.bf16 %v529_v46, %v529_v46  ;;  %v559_v51 = vpack.c.bf16 %v531_v47, %v531_v47 }
 0x162   :  { %977 = vmatprep.mubr.bf16.mxu0 %v558_v48  ;;  %1018 = vmatprep.mubr.bf16.mxu1 %v560_v49 }
 0x163   :  { %978 = vmatmul.mubr.bf16.vlgmr.msra.gmra.mrb[4].mxu0 %v557_v50  ;;  %1019 = vmatmul.mubr.bf16.vlgmr.msra.gmra.mrb[4].mxu1 %v559_v51 }
 0x236   :  { %v979_v54 = vpop.f32.mrb[4].mxu0  ;;  %v1020_v55 = vpop.f32.mrb[4].mxu1 }
 0x237   :  { %v1021_v57 = vadd.f32 %v1020_v55, %v979_v54  ;;  %v981_v58 = vpop.f32.mrb[5].mxu0  ;;  %v1022_v59 = vpop.f32.mrb[5].mxu1 }
 0x238   :  { %v1023_v60 = vadd.f32 %v1022_v59, %v981_v58  ;;  %v983_v61 = vpop.f32.mrb[6].mxu0  ;;  %v1024_v62 = vpop.f32.mrb[6].mxu1 }
 0x239   :  { %v1027_v63 = vadd.f32 %v1021_v57, %v546_v53  ;;  %v984_v0 = vpop.f32.mrb[7].mxu0  ;;  %v1025_v1 = vpop.f32.mrb[7].mxu1 }
 0x23a   :  { %v1028_v2 = vadd.f32 %v1023_v60, %v550_v56 }
 0x23b   :  { %1029 = vst [vmem:[#allocation7] sm:$0xff] %v1027_v63 }
 0x23c   :  { %1030 = vst [vmem:[#allocation7 + $0x8] sm:$0xff] %v1028_v2 }
 0x23d   :  { %1362 = shalt.err (!%p1359_p6)
}
 0x23e   :  { %s1363_s8 = scalar_lea.hbm %s1505_s6, 256 }
 0x23f   :  { %p1364_p7 = scmp.ne.s32.totalorder %s1505_s6, %s1363_s8  ;;  %p1367_p8 = scmp.lt.u32.totalorder %s1363_s8, %s1505_s6 }
 0x241   :  { %p1369_p9 = pnand %p1367_p8, %p1364_p7 }
 0x243   :  { %1372 = shalt.err (!%p1369_p9)
}
 0x244   :  { %1040 = dma.vmem_to_hbm [thread:$0]  %s1038_s29, 256, %s1505_s6, [#allocation4]  }
 0x245   :  { %1377 = dma.done.wait [#allocation4], 256  }
 0x246   :  { %1378 = vsyncadd [#allocation4], 4294967040 }
 0x247   :  { %1044 = vsyncpa [#allocation3], 1 }
 0x248   :  { %1045 = vsyncpa [#allocation6], 1 }
 0x249   :  { %1046 = vsyncpa [#allocation4], 1 }

</bundles_post_ra>
